<compile_context>
chip_gen: v5e
topology: v5e:2x2
jax: 0.10.0
libtpu: 0.0.40
codegen_flags: <defaults>
</compile_context>

<pallas_src>
import math
from functools import partial

import jax
import jax.numpy as jnp
from jax import lax
from jax.experimental import pallas as pl
from jax.experimental.pallas import tpu as pltpu

_VMEM_LIMIT = 32 * 1024 * 1024  # safe on v5e (raises 16MiB default) and v7x (64MiB phys)


def _pick_tile(dim, pref):
    """Largest tile <= pref that evenly divides dim (falls back to full dim)."""
    if dim <= pref:
        return dim
    return pref if dim % pref == 0 else dim


# ----------------------------------------------------------------------------
# Tiled linear: y = x @ w + b
# ----------------------------------------------------------------------------
def _linear_kernel(x_ref, w_ref, b_ref, o_ref, acc_ref):
    k = pl.program_id(2)

    @pl.when(k == 0)
    def _():
        acc_ref[...] = jnp.zeros_like(acc_ref)

    acc_ref[...] += jnp.dot(x_ref[...], w_ref[...],
                            preferred_element_type=jnp.float32)

    @pl.when(k == pl.num_programs(2) - 1)
    def _():
        o_ref[...] = (acc_ref[...] + b_ref[...].astype(jnp.float32)).astype(o_ref.dtype)


def linear_pallas(x, w, b, *, tm=256, tn=256, tk=512):
    """y = x @ w + b with x:(M,K), w:(K,N), b:(N,). Tiled + pipelined."""
    m, kdim = x.shape
    n = w.shape[1]
    tm = _pick_tile(m, tm)
    tn = _pick_tile(n, tn)
    tk = _pick_tile(kdim, tk)
    b2 = b.reshape(1, n)
    grid = (m // tm, n // tn, kdim // tk)
    return pl.pallas_call(
        _linear_kernel,
        out_shape=jax.ShapeDtypeStruct((m, n), x.dtype),
        grid_spec=pltpu.PrefetchScalarGridSpec(
            num_scalar_prefetch=0,
            grid=grid,
            in_specs=[
                pl.BlockSpec((tm, tk), lambda i, j, k: (i, k)),
                pl.BlockSpec((tk, tn), lambda i, j, k: (k, j)),
                pl.BlockSpec((1, tn), lambda i, j, k: (0, j)),
            ],
            out_specs=pl.BlockSpec((tm, tn), lambda i, j, k: (i, j)),
            scratch_shapes=[pltpu.VMEM((tm, tn), jnp.float32)],
        ),
        compiler_params=pltpu.CompilerParams(
            dimension_semantics=("parallel", "parallel", "arbitrary"),
            vmem_limit_bytes=_VMEM_LIMIT,
        ),
    )(x, w, b2)


# ----------------------------------------------------------------------------
# Flash-style multi-head attention on the packed (B, S, D=H*d_k) layout.
# Heads are column slices handled inside the kernel (no HBM head transposes).
# ----------------------------------------------------------------------------
def _mha_flash_kernel(q_ref, k_ref, v_ref, o_ref, m_sc, l_sc, acc_sc,
                      *, num_heads, scale):
    kv_idx = pl.program_id(2)

    @pl.when(kv_idx == 0)
    def _():
        m_sc[...] = jnp.full_like(m_sc, -jnp.inf)
        l_sc[...] = jnp.zeros_like(l_sc)
        acc_sc[...] = jnp.zeros_like(acc_sc)

    d = q_ref.shape[-1]
    d_k = d // num_heads

    # Fold 1/sqrt(d_k) into q once per q-tile (S*d_k elements, not S*S).
    q_scaled = (q_ref[...].astype(jnp.float32) * scale).astype(q_ref.dtype)
    k = k_ref[...]
    v = v_ref[...]

    # Static (unrolled) loop over heads: clean 2-D MXU matmuls per head.
    for h in range(num_heads):
        lo, hi = h * d_k, (h + 1) * d_k
        qh = q_scaled[:, lo:hi]                       # (tq, d_k)
        kh = k[:, lo:hi]                              # (tkv, d_k)
        vh = v[:, lo:hi]                              # (tkv, d_k)

        # q @ k^T via contraction on the last dims (no explicit transpose).
        s = lax.dot_general(qh, kh, (((1,), (1,)), ((), ())),
                            preferred_element_type=jnp.float32)   # (tq, tkv)

        m_prev = m_sc[:, h:h + 1]                                 # (tq, 1)
        m_new = jnp.maximum(m_prev, jnp.max(s, axis=-1, keepdims=True))
        alpha = jnp.exp(m_prev - m_new)
        p = jnp.exp(s - m_new)                                    # (tq, tkv) f32

        l_sc[:, h:h + 1] = alpha * l_sc[:, h:h + 1] + jnp.sum(p, axis=-1,
                                                              keepdims=True)
        acc_sc[:, lo:hi] = alpha * acc_sc[:, lo:hi] + jnp.dot(
            p.astype(v.dtype), vh, preferred_element_type=jnp.float32)
        m_sc[:, h:h + 1] = m_new

    @pl.when(kv_idx == pl.num_programs(2) - 1)
    def _():
        inv_l = pl.reciprocal(l_sc[...], approx=True)             # (tq, H)
        cols = [acc_sc[:, h * d_k:(h + 1) * d_k] * inv_l[:, h:h + 1]
                for h in range(num_heads)]
        # Single lane-dense (full-D) store of the normalized output tile.
        o_ref[...] = jnp.concatenate(cols, axis=-1).astype(o_ref.dtype)


def flash_attention_pallas(q, k, v, num_heads, *, tq=128, tkv=256):
    """q, k, v: (B, S, D) with heads packed along D -> (B, S, D)."""
    b, s, d = q.shape
    d_k = d // num_heads
    tq = _pick_tile(s, tq)
    tkv = _pick_tile(s, tkv)
    scale = 1.0 / math.sqrt(d_k)
    grid = (b, s // tq, s // tkv)

    q_spec = pl.BlockSpec((None, tq, d), lambda bi, qi, ki: (bi, qi, 0))
    kv_spec = pl.BlockSpec((None, tkv, d), lambda bi, qi, ki: (bi, ki, 0))

    return pl.pallas_call(
        partial(_mha_flash_kernel, num_heads=num_heads, scale=scale),
        out_shape=jax.ShapeDtypeStruct((b, s, d), q.dtype),
        grid_spec=pltpu.PrefetchScalarGridSpec(
            num_scalar_prefetch=0,
            grid=grid,
            in_specs=[q_spec, kv_spec, kv_spec],
            out_specs=pl.BlockSpec((None, tq, d), lambda bi, qi, ki: (bi, qi, 0)),
            scratch_shapes=[
                pltpu.VMEM((tq, num_heads), jnp.float32),   # running max  (per head)
                pltpu.VMEM((tq, num_heads), jnp.float32),   # running denom(per head)
                pltpu.VMEM((tq, d), jnp.float32),           # output accumulator
            ],
        ),
        compiler_params=pltpu.CompilerParams(
            dimension_semantics=("parallel", "parallel", "arbitrary"),
            vmem_limit_bytes=_VMEM_LIMIT,
        ),
    )(q, k, v)


# ----------------------------------------------------------------------------
# Parameter packing (once, outside the hot path: no per-call weight transposes)
# ----------------------------------------------------------------------------
def pack_params(params):
    """params: list of 4 (weight(D_out,D_in), bias(D_out,)) nn.Linear-style pairs."""
    (w_q, b_q), (w_k, b_k), (w_v, b_v), (w_o, b_o) = params
    return {
        "w_q": w_q.T, "b_q": b_q,
        "w_k": w_k.T, "b_k": b_k,
        "w_v": w_v.T, "b_v": b_v,
        "w_qkv": jnp.concatenate([w_q.T, w_k.T, w_v.T], axis=1),   # (D, 3D)
        "b_qkv": jnp.concatenate([b_q, b_k, b_v], axis=0),          # (3D,)
        "w_o": w_o.T, "b_o": b_o,
    }


# ----------------------------------------------------------------------------
# MultiHeadedAttn forward
# ----------------------------------------------------------------------------
def multi_headed_attn(packed, query, key, value, num_heads):
    """General (cross-attention capable) path. query/key/value: (B, S, D)."""
    b, s, d = query.shape
    q = linear_pallas(query.reshape(b * s, d), packed["w_q"], packed["b_q"]).reshape(b, s, d)
    k = linear_pallas(key.reshape(b * s, d), packed["w_k"], packed["b_k"]).reshape(b, s, d)
    v = linear_pallas(value.reshape(b * s, d), packed["w_v"], packed["b_v"]).reshape(b, s, d)

    # TODO(synk): optional `mask` (masked_fill before softmax) not implemented.
    x = flash_attention_pallas(q, k, v, num_heads)               # (B, S, D)
    out = linear_pallas(x.reshape(b * s, d), packed["w_o"], packed["b_o"])
    return out.reshape(b, s, d)


def multi_headed_self_attn(packed, x, num_heads):
    """Self-attention fast path: single fused QKV projection (x read once)."""
    b, s, d = x.shape
    qkv = linear_pallas(x.reshape(b * s, d), packed["w_qkv"], packed["b_qkv"])
    qkv = qkv.reshape(b, s, 3, d)
    q, k, v = qkv[:, :, 0, :], qkv[:, :, 1, :], qkv[:, :, 2, :]
    attn = flash_attention_pallas(q, k, v, num_heads)
    out = linear_pallas(attn.reshape(b * s, d), packed["w_o"], packed["b_o"])
    return out.reshape(b, s, d)


# Pure-JAX reference for sanity checking.
def multi_headed_attn_ref(params, query, key, value, num_heads):
    b, s, d = query.shape
    d_k = d // num_heads

    def proj(idx, x):
        w, bias = params[idx]
        y = x @ w.T + bias
        return y.reshape(b, s, num_heads, d_k).transpose(0, 2, 1, 3)

    q, k, v = proj(0, query), proj(1, key), proj(2, value)
    scores = jnp.einsum("bhqd,bhkd->bhqk", q, k) / math.sqrt(d_k)
    p = jax.nn.softmax(scores, axis=-1)
    x = jnp.einsum("bhqk,bhkd->bhqd", p, v)
    x = x.transpose(0, 2, 1, 3).reshape(b, s, d)
    w_o, b_o = params[3]
    return x @ w_o.T + b_o


# ----------------------------------------------------------------------------
if __name__ == "__main__":
    B, S, D, H = 2, 8, 32, 4

    key0 = jax.random.PRNGKey(0)
    keys = jax.random.split(key0, 12)

    # Deterministic nn.Linear-style params: 4 linears, each (D, D) weight + (D,) bias.
    bound = 1.0 / math.sqrt(D)
    params = []
    for i in range(4):
        w = jax.random.uniform(keys[i], (D, D), jnp.float32, -bound, bound)
        bb = jax.random.uniform(keys[4 + i], (D,), jnp.float32, -bound, bound)
        params.append((w, bb))

    packed = pack_params(params)   # one-time weight transpose/pack, outside hot path

    query = jax.random.normal(keys[8], (B, S, D), jnp.float32)
    key_ = jax.random.normal(keys[9], (B, S, D), jnp.float32)
    value = jax.random.normal(keys[10], (B, S, D), jnp.float32)

    # Cross-attention path (three independent projections).
    out = multi_headed_attn(packed, query, key_, value, H)
    out = jax.block_until_ready(out)
    ref = multi_headed_attn_ref(params, query, key_, value, H)
    assert out.shape == (B, S, D)
    err = float(jnp.max(jnp.abs(out - ref)))
    # 5e-3 tolerance: approx=True reciprocal (EUP) + MXU f32-multipass rounding.
    assert err < 5e-3, f"cross-attention mismatch vs reference: {err}"

    # Self-attention fast path (fused (D,3D) QKV projection).
    out_self = multi_headed_self_attn(packed, query, H)
    out_self = jax.block_until_ready(out_self)
    ref_self = multi_headed_attn_ref(params, query, query, query, H)
    err_self = float(jnp.max(jnp.abs(out_self - ref_self)))
    assert err_self < 5e-3, f"self-attention mismatch vs reference: {err_self}"

    print("KERNEL_OK")
</pallas_src>

<mosaic_0001>
module attributes {stable_mosaic.version = 11 : i64} {
  func.func @_linear_kernel(%arg0: i32, %arg1: i32, %arg2: i32, %arg3: memref<16x32xf32, #tpu.memory_space<vmem>>, %arg4: memref<32x32xf32, #tpu.memory_space<vmem>>, %arg5: memref<1x32xf32, #tpu.memory_space<vmem>>, %arg6: memref<16x32xf32, #tpu.memory_space<vmem>>, %arg7: memref<16x32xf32, #tpu.memory_space<vmem>>) attributes {dimension_semantics = [#tpu.dimension_semantics<parallel>, #tpu.dimension_semantics<parallel>, #tpu.dimension_semantics<arbitrary>], iteration_bounds = array<i64: 1, 1, 1>, scalar_prefetch = 0 : i64, scratch_operands = 1 : i64, tpu.core_type = #tpu.core_type<tc>, window_params = [{transform_indices = @transform_0, window_bounds = array<i64: 16, 32>}, {transform_indices = @transform_1, window_bounds = array<i64: 32, 32>}, {transform_indices = @transform_2, window_bounds = array<i64: 1, 32>}, {transform_indices = @transform_3, window_bounds = array<i64: 16, 32>}]} {
    %c0_i32 = arith.constant 0 : i32
    %0 = arith.cmpi eq, %arg2, %c0_i32 : i32
    %1 = arith.extui %0 : i1 to i32
    %c0_i32_0 = arith.constant 0 : i32
    %2 = arith.cmpi ne, %1, %c0_i32_0 : i32
    scf.if %2 {
      %cst_10 = arith.constant 0.000000e+00 : f32
      %12 = vector.broadcast %cst_10 : f32 to vector<16x32xf32>
      %c0_11 = arith.constant 0 : index
      %c0_12 = arith.constant 0 : index
      %13 = vector.load %arg7[%c0_11, %c0_12] : memref<16x32xf32, #tpu.memory_space<vmem>>, vector<16x32xf32>
      tpu.vector_store %arg7[%c0_11, %c0_12], %12 {strides = array<i32>} : memref<16x32xf32, #tpu.memory_space<vmem>>, vector<16x32xf32>,
    } else {
    }
    %c0 = arith.constant 0 : index
    %c0_1 = arith.constant 0 : index
    %3 = vector.load %arg7[%c0, %c0_1] : memref<16x32xf32, #tpu.memory_space<vmem>>, vector<16x32xf32>
    %c0_2 = arith.constant 0 : index
    %c0_3 = arith.constant 0 : index
    %4 = vector.load %arg3[%c0_2, %c0_3] : memref<16x32xf32, #tpu.memory_space<vmem>>, vector<16x32xf32>
    %c0_4 = arith.constant 0 : index
    %c0_5 = arith.constant 0 : index
    %5 = vector.load %arg4[%c0_4, %c0_5] : memref<32x32xf32, #tpu.memory_space<vmem>>, vector<32x32xf32>
    %cst = arith.constant dense<0.000000e+00> : vector<16x32xf32>
    %6 = tpu.matmul %4, %5, %cst {dimension_numbers = #tpu.dot_dimension_numbers<[1], [0], [0], [1], [0, 0, 1, 1], [], []>} : vector<16x32xf32>, vector<32x32xf32>, vector<16x32xf32> -> vector<16x32xf32>
    %7 = arith.addf %3, %6 : vector<16x32xf32>
    %c0_6 = arith.constant 0 : index
    %c0_7 = arith.constant 0 : index
    %8 = vector.load %arg7[%c0_6, %c0_7] : memref<16x32xf32, #tpu.memory_space<vmem>>, vector<16x32xf32>
    tpu.vector_store %arg7[%c0_6, %c0_7], %7 {strides = array<i32>} : memref<16x32xf32, #tpu.memory_space<vmem>>, vector<16x32xf32>,
    %c0_i32_8 = arith.constant 0 : i32
    %9 = arith.cmpi eq, %arg2, %c0_i32_8 : i32
    %10 = arith.extui %9 : i1 to i32
    %c0_i32_9 = arith.constant 0 : i32
    %11 = arith.cmpi ne, %10, %c0_i32_9 : i32
    scf.if %11 {
      %c0_10 = arith.constant 0 : index
      %c0_11 = arith.constant 0 : index
      %12 = vector.load %arg7[%c0_10, %c0_11] : memref<16x32xf32, #tpu.memory_space<vmem>>, vector<16x32xf32>
      %c0_12 = arith.constant 0 : index
      %c0_13 = arith.constant 0 : index
      %13 = vector.load %arg5[%c0_12, %c0_13] : memref<1x32xf32, #tpu.memory_space<vmem>>, vector<1x32xf32>
      %14 = vector.broadcast %13 : vector<1x32xf32> to vector<16x32xf32>
      %15 = arith.addf %12, %14 : vector<16x32xf32>
      %c0_14 = arith.constant 0 : index
      %c0_15 = arith.constant 0 : index
      %16 = vector.load %arg6[%c0_14, %c0_15] : memref<16x32xf32, #tpu.memory_space<vmem>>, vector<16x32xf32>
      tpu.vector_store %arg6[%c0_14, %c0_15], %15 {strides = array<i32>} : memref<16x32xf32, #tpu.memory_space<vmem>>, vector<16x32xf32>,
    } else {
    }
    return
  }
  func.func @transform_0(%arg0: i32, %arg1: i32, %arg2: i32) -> (i32, i32) {
    %c0_i32 = arith.constant 0 : i32
    return %arg0, %arg2 : i32, i32
  }
  func.func @transform_1(%arg0: i32, %arg1: i32, %arg2: i32) -> (i32, i32) {
    %c0_i32 = arith.constant 0 : i32
    return %arg2, %arg1 : i32, i32
  }
  func.func @transform_2(%arg0: i32, %arg1: i32, %arg2: i32) -> (i32, i32) {
    %c0_i32 = arith.constant 0 : i32
    %c0_i32_0 = arith.constant 0 : i32
    return %c0_i32, %arg1 : i32, i32
  }
  func.func @transform_3(%arg0: i32, %arg1: i32, %arg2: i32) -> (i32, i32) {
    %c0_i32 = arith.constant 0 : i32
    return %arg0, %arg1 : i32, i32
  }
}

</mosaic_0001>

<bundles_post_ra>
// kernel: tpu_custom_call.1
= control target key start
LH: loop header
LB: loop body
LE: loop exit
PB: predicated region body
PF: predicated region fallthrough
CT: control target
= control target key end

     0   :  { %8 = vsyncpa [#allocation4], 0  ;;  %s275_s0 = inlined_call_operand.hbm [shape: f32[16,32], index: 0, kind: input, shape index: {}]   ;;  %s276_s1 = inlined_call_operand.hbm [shape: f32[32,32], index: 1, kind: input, shape index: {}]   ;;  %s277_s2 = inlined_call_operand.vmem [shape: f32[1,32], index: 2, kind: input, shape index: {}]   ;;  %s278_s3 = inlined_call_operand.hbm [shape: f32[16,32], index: 3, kind: output, shape index: {}]  }
   0x1   :  { %9 = vsyncpa [#allocation7], 0 }
   0x2   :  { %10 = vsyncpa [#allocation5], 0  ;;  %s15_s14 = sshll.u32 %s275_s0, 4  ;;  %s220_s15 = smov [#allocation3]   ;;  %s16_s14 = int_to_ptr.hbm [resolvable:$true] %s15_s14 }
   0x3   :  { %s17_s16 = sshll.u32 %s220_s15, 4  ;;  %s28_s19 = sshll.u32 %s276_s1, 4  ;;  %s18_s16 = int_to_ptr.vmem [resolvable:$true] %s17_s16  ;;  %s29_s19 = int_to_ptr.hbm [resolvable:$true] %s28_s19 }
   0x4   :  { %s221_s20 = smov 128   ;;  %s222_s21 = smov 8  }
   0x5   :  { %23 = dma.hbm_to_vmem [thread:$0]  %s16_s14, 256, %s18_s16, [#allocation4], %s221_s20, %s221_s20, %s222_s21  }
   0x6   :  { %s223_s22 = smov [#allocation6]  }
   0x7   :  { %s30_s23 = sshll.u32 %s223_s22, 4  ;;  %s31_s23 = int_to_ptr.vmem [resolvable:$true] %s30_s23 }
   0x8   :  { %36 = dma.hbm_to_vmem [thread:$0]  %s29_s19, 512, %s31_s23, [#allocation7], %s221_s20, %s221_s20, %s222_s21  }
   0x9   :  { %214 = dma.done.wait [#allocation4], 256  }
   0xa   :  { %215 = vsyncadd [#allocation4], 4294967040 }
   0xb   :  { %216 = dma.done.wait [#allocation7], 512  }
   0xc   :  { %217 = vsyncadd [#allocation7], 4294966784  ;;  %vm51_vm0 = vcmask 261120   ;;  %v224_v0 = vmov 0.0   ;;  %v61_v1 = vld [vmem:[#allocation6 + $0x18] sm:$0xff]  ;;  %v60_v2 = vld [vmem:[#allocation6 + $0x10] sm:$0xff] }
   0xd   :  { %52 = vst.msk [vmem:[#allocation2] sm:$0xff] %vm51_vm0, %v224_v0  ;;  %81 = vmatpush.msra.mxu0 %v61_v1  ;;  %131 = vmatpush.msra.mxu1 %v61_v1  ;;  %v59_v3 = vld [vmem:[#allocation6 + $0x8] sm:$0xff]  ;;  %v58_v4 = vld [vmem:[#allocation6] sm:$0xff]  ;;  %v56_v5 = vld [vmem:[#allocation3] sm:$0xff]  ;;  %s225_s24 = smov [#allocation8]   ;;  %s115_s28 = sshll.u32 %s278_s3, 4  ;;  %s116_s28 = int_to_ptr.hbm [resolvable:$true] %s115_s28 }
   0xe   :  { %53 = vst.msk [vmem:[#allocation2 + $0x8] sm:$0xff] %vm51_vm0, %v224_v0  ;;  %v57_v6 = vld [vmem:[#allocation3 + $0x8] sm:$0xff]  ;;  %v141_v13 = vld [vmem:[%s277_s2] ss:$0 sm:$0xff]  ;;  %s113_s25 = sshll.u32 %s225_s24, 4  ;;  %s114_s25 = int_to_ptr.vmem [resolvable:$true] %s113_s25 }
   0xf   :  { %82 = vmatpush.msra.mxu0 %v60_v2  ;;  %132 = vmatpush.msra.mxu1 %v60_v2 }
  0x11   :  { %83 = vmatpush.msra.mxu0 %v59_v3  ;;  %133 = vmatpush.msra.mxu1 %v59_v3 }
  0x13   :  { %84 = vmatpush.msra.mxu0 %v58_v4  ;;  %134 = vmatpush.msra.mxu1 %v58_v4 }
  0x14   :  { %129 = vmatmul.msk.f32.vlgmr.msra.gmra.mxu0 %vm51_vm0, %v56_v5  ;;  %130 = vmatmul.msk.f32.vlgmr.msra.gmra.mxu1 %vm51_vm0, %v57_v6  ;;  %v54_v7 = vld [vmem:[#allocation2] sm:$0xff] }
  0x15   :  { %v55_v8 = vld [vmem:[#allocation2 + $0x8] sm:$0xff] }
  0x91   :  { %v86_v9 = vpop.f32.mrf.mxu0  ;;  %v89_v10 = vpop.f32.mrf.mxu1 }
  0x92   :  { %v92_v11 = vadd.f32 %v86_v9, %v54_v7  ;;  %v93_v12 = vadd.f32 %v89_v10, %v55_v8 }
  0x94   :  { %94 = vst.msk [vmem:[#allocation2] sm:$0xff] %vm51_vm0, %v92_v11 }
  0x95   :  { %95 = vst.msk [vmem:[#allocation2 + $0x8] sm:$0xff] %vm51_vm0, %v93_v12 }
  0x9b   :  { %v99_v14 = vld [vmem:[#allocation2] sm:$0xff] }
  0x9c   :  { %v100_v15 = vld [vmem:[#allocation2 + $0x8] sm:$0xff]  ;;  %v105_v16 = vadd.f32 %v141_v13, %v99_v14 }
  0x9d   :  { %v106_v17 = vadd.f32 %v141_v13, %v100_v15 }
  0x9e   :  { %107 = vst.msk [vmem:[#allocation8] sm:$0xff] %vm51_vm0, %v105_v16 }
  0x9f   :  { %108 = vst.msk [vmem:[#allocation8 + $0x8] sm:$0xff] %vm51_vm0, %v106_v17 }
  0xa0   :  { %121 = dma.vmem_to_hbm [thread:$0]  %s114_s25, 256, %s116_s28, [#allocation5], %s221_s20, %s221_s20, %s222_s21  }
  0xa1   :  { %218 = dma.done.wait [#allocation5], 256  }
  0xa2   :  { %219 = vsyncadd [#allocation5], 4294967040 }
  0xa3   :  { %126 = vsyncpa [#allocation4], 1 }
  0xa4   :  { %127 = vsyncpa [#allocation7], 1 }
  0xa5   :  { %128 = vsyncpa [#allocation5], 1 }

</bundles_post_ra>
